<compile_context>
chip_gen: v7x
topology: tpu7x:2x2x1
jax: 0.10.0
libtpu: 0.0.40
codegen_flags: <defaults>
</compile_context>

<pallas_src>
import jax
import jax.numpy as jnp
import numpy as np
from jax import lax
from jax.experimental import pallas as pl
from jax.experimental.pallas import tpu as pltpu

# ---- shapes implied by the module (small, synthetic config) ----
N, C_IN, H, W = 2, 4, 16, 16        # batch, in_channels, spatial
C_OUT = 8                           # conv out_channels
KH = KW = 3                         # conv kernel_size
PAD = 1                             # conv padding (SAME)
POOL = 2                            # MaxPool2d kernel_size (stride = kernel_size)
HP, WP = H // POOL, W // POOL       # pooled spatial
FLAT = C_OUT * HP * WP              # flattened feature size (512)
HID = 32                            # f1 hidden
OUT = 10                            # f2 output
OUT_PAD = 128                       # lane-dense padded output width
K = KH * KW * C_IN                  # im2col contraction size (36)


# ----------------------------- Pallas kernels -----------------------------

def conv_pool_bn_relu_kernel(p_ref, w_ref, scale_ref, shift_ref, o_ref):
    """Fused Conv2d (im2col matmul, whole batch) + MaxPool2x2 + BatchNorm(inference) + ReLU.

    p_ref     : (4*N*HP*WP, K)   rows ordered (pool position d, sample n, pooled spatial s)
    w_ref     : (K, C_OUT)
    scale_ref : (1, C_OUT)       folded BN scale
    shift_ref : (1, C_OUT)       folded BN shift (conv bias already folded in)
    o_ref     : (N*HP*WP, C_OUT) rows ordered (n, s)
    """
    conv = jnp.dot(p_ref[...], w_ref[...], preferred_element_type=jnp.float32)  # (4*N*HP*WP, C_OUT)
    ns = N * HP * WP
    pooled = conv[0:ns, :]
    for d in range(1, POOL * POOL):              # static unroll: max over the 2x2 pool window
        pooled = jnp.maximum(pooled, conv[d * ns:(d + 1) * ns, :])
    o_ref[...] = jnp.maximum(pooled * scale_ref[...] + shift_ref[...], 0.0)


def mlp_kernel(x_ref, w1_ref, b1_ref, w2_ref, b2_ref, o_ref):
    """Fused f1 -> ReLU -> f2 -> ReLU, lane-dense (N, OUT_PAD) output."""
    h = jnp.maximum(
        jnp.dot(x_ref[...], w1_ref[...], preferred_element_type=jnp.float32) + b1_ref[...], 0.0)
    y = jnp.dot(h, w2_ref[...], preferred_element_type=jnp.float32) + b2_ref[...]
    o_ref[...] = jnp.maximum(y, 0.0)


# ----------------------------- JAX glue -----------------------------

def im2col_pool_patches(x_nhwc):
    """(N, H, W, C_IN) -> (4*N*HP*WP, K); rows ordered (pool position, sample, pooled spatial)."""
    xp = jnp.pad(x_nhwc, ((0, 0), (PAD, PAD), (PAD, PAD), (0, 0)))
    cols = [xp[:, i:i + H, j:j + W, :] for i in range(KH) for j in range(KW)]
    p = jnp.stack(cols, axis=3).reshape(N, H, W, K)                    # (N, H, W, K)
    p = p.reshape(N, HP, POOL, WP, POOL, K).transpose(2, 4, 0, 1, 3, 5)  # (di, dj, N, HP, WP, K)
    return p.reshape(POOL * POOL * N * HP * WP, K)


def conv_block(patches, wc2d, bn_scale, bn_shift):
    return pl.pallas_call(
        conv_pool_bn_relu_kernel,
        out_shape=jax.ShapeDtypeStruct((N * HP * WP, C_OUT), jnp.float32),
        grid=(1,),
        in_specs=[
            pl.BlockSpec((POOL * POOL * N * HP * WP, K), lambda i: (0, 0)),
            pl.BlockSpec((K, C_OUT), lambda i: (0, 0)),
            pl.BlockSpec((1, C_OUT), lambda i: (0, 0)),
            pl.BlockSpec((1, C_OUT), lambda i: (0, 0)),
        ],
        out_specs=pl.BlockSpec((N * HP * WP, C_OUT), lambda i: (0, 0)),
        compiler_params=pltpu.CompilerParams(dimension_semantics=("arbitrary",)),
    )(patches, wc2d, bn_scale, bn_shift)


def mlp(feats, w1p, b1, w2p, b2p):
    return pl.pallas_call(
        mlp_kernel,
        out_shape=jax.ShapeDtypeStruct((N, OUT_PAD), jnp.float32),
        grid=(1,),
        in_specs=[
            pl.BlockSpec((N, FLAT), lambda i: (0, 0)),
            pl.BlockSpec((FLAT, HID), lambda i: (0, 0)),
            pl.BlockSpec((1, HID), lambda i: (0, 0)),
            pl.BlockSpec((HID, OUT_PAD), lambda i: (0, 0)),
            pl.BlockSpec((1, OUT_PAD), lambda i: (0, 0)),
        ],
        out_specs=pl.BlockSpec((N, OUT_PAD), lambda i: (0, 0)),
        compiler_params=pltpu.CompilerParams(dimension_semantics=("arbitrary",)),
    )(feats, w1p, b1, w2p, b2p)


def prepare_params(p):
    """One-time parameter repacking (setup time, not on the hot path)."""
    wc2d = p["w_conv"].reshape(K, C_OUT)                           # im2col weight matrix
    bn_scale = p["bn_scale"]                                       # (1, C_OUT)
    bn_shift = p["bn_scale"] * p["b_conv"] + p["bn_shift"]         # fold conv bias into BN shift
    # permute w1 rows from PyTorch NCHW-flatten order (c*HP*WP + s) to the kernel's
    # NHWC-flatten order (s*C_OUT + c) so no activation transpose is needed.
    w1p = p["w1"].reshape(C_OUT, HP * WP, HID).transpose(1, 0, 2).reshape(FLAT, HID)
    # zero-pad f2 to 128 output lanes so the final store is lane-dense.
    w2p = jnp.zeros((HID, OUT_PAD), jnp.float32).at[:, :OUT].set(p["w2"])
    b2p = jnp.zeros((1, OUT_PAD), jnp.float32).at[:, :OUT].set(p["b2"])
    return dict(wc2d=wc2d, bn_scale=bn_scale, bn_shift=bn_shift,
                w1=w1p, b1=p["b1"], w2=w2p, b2=b2p)


@jax.jit
def resnet_forward(x_nchw, prep):
    x_nhwc = jnp.transpose(x_nchw, (0, 2, 3, 1))
    patches = im2col_pool_patches(x_nhwc)                 # wrapper glue (toy size; see TODO)
    act = conv_block(patches, prep["wc2d"], prep["bn_scale"], prep["bn_shift"])  # (N*HP*WP, C_OUT)
    feats = act.reshape(N, FLAT)                          # contiguous -> zero-copy reshape, no transpose
    out = mlp(feats, prep["w1"], prep["b1"], prep["w2"], prep["b2"])             # (N, OUT_PAD)
    return out[:, :OUT]                                   # drop lane padding


# ----------------------------- pure-JAX reference -----------------------------

def reference_forward(x_nchw, params):
    x = jnp.transpose(x_nchw, (0, 2, 3, 1))
    conv = lax.conv_general_dilated(
        x, params["w_conv"], window_strides=(1, 1),
        padding=((PAD, PAD), (PAD, PAD)),
        dimension_numbers=("NHWC", "HWIO", "NHWC"))
    conv = conv + params["b_conv"].reshape(1, 1, 1, C_OUT)
    pooled = lax.reduce_window(conv, -jnp.inf, lax.max,
                               (1, POOL, POOL, 1), (1, POOL, POOL, 1), "VALID")
    bn = pooled * params["bn_scale"].reshape(1, 1, 1, C_OUT) \
         + params["bn_shift"].reshape(1, 1, 1, C_OUT)
    act = jnp.maximum(bn, 0.0)
    feats = jnp.transpose(act, (0, 3, 1, 2)).reshape(N, FLAT)   # PyTorch NCHW flatten
    h = jnp.maximum(feats @ params["w1"] + params["b1"], 0.0)
    return jnp.maximum(h @ params["w2"] + params["b2"], 0.0)


# ----------------------------- main -----------------------------

if __name__ == "__main__":
    key = jax.random.PRNGKey(0)
    ks = jax.random.split(key, 11)

    # deterministic synthetic parameters (PyTorch conventions, NCHW flatten order for w1)
    w_conv = jax.random.normal(ks[0], (KH, KW, C_IN, C_OUT), jnp.float32) / np.sqrt(K)
    b_conv = 0.1 * jax.random.normal(ks[1], (1, C_OUT), jnp.float32)
    gamma = 1.0 + 0.1 * jax.random.normal(ks[2], (C_OUT,), jnp.float32)
    beta = 0.1 * jax.random.normal(ks[3], (C_OUT,), jnp.float32)
    r_mean = 0.1 * jax.random.normal(ks[4], (C_OUT,), jnp.float32)
    r_var = 1.0 + 0.5 * jax.random.uniform(ks[5], (C_OUT,), jnp.float32)
    eps = 1e-5
    inv_std = gamma / jnp.sqrt(r_var + eps)
    bn_scale = inv_std.reshape(1, C_OUT)
    bn_shift = (beta - r_mean * inv_std).reshape(1, C_OUT)
    w1 = jax.random.normal(ks[6], (FLAT, HID), jnp.float32) / np.sqrt(FLAT)
    b1 = 0.1 * jax.random.normal(ks[7], (1, HID), jnp.float32)
    w2 = jax.random.normal(ks[8], (HID, OUT), jnp.float32) / np.sqrt(HID)
    b2 = 0.1 * jax.random.normal(ks[9], (1, OUT), jnp.float32)

    params = dict(w_conv=w_conv, b_conv=b_conv, bn_scale=bn_scale, bn_shift=bn_shift,
                  w1=w1, b1=b1, w2=w2, b2=b2)
    prep = prepare_params(params)          # one-time repacking (bias folding, w1 permute, f2 pad)

    # PyTorch-convention NCHW input
    x = jax.random.normal(ks[10], (N, C_IN, H, W), jnp.float32)

    out = resnet_forward(x, prep)
    out = jax.block_until_ready(out)
    assert out.shape == (N, OUT), out.shape

    ref = reference_forward(x, params)
    np.testing.assert_allclose(np.asarray(out), np.asarray(ref), rtol=1e-4, atol=1e-4)

    print("KERNEL_OK")
</pallas_src>

<mosaic_0001>
module attributes {stable_mosaic.version = 11 : i64} {
  func.func @conv_pool_bn_relu_kernel(%arg0: i32, %arg1: memref<512x36xf32, #tpu.memory_space<vmem>>, %arg2: memref<36x8xf32, #tpu.memory_space<vmem>>, %arg3: memref<1x8xf32, #tpu.memory_space<vmem>>, %arg4: memref<1x8xf32, #tpu.memory_space<vmem>>, %arg5: memref<128x8xf32, #tpu.memory_space<vmem>>) attributes {dimension_semantics = [#tpu.dimension_semantics<arbitrary>], iteration_bounds = array<i64: 1>, scalar_prefetch = 0 : i64, scratch_operands = 0 : i64, tpu.core_type = #tpu.core_type<tc>, window_params = [{pipeline_mode = #tpu.pipeline_mode<synchronous>, transform_indices = @transform_0, window_bounds = array<i64: 512, 36>}, {pipeline_mode = #tpu.pipeline_mode<synchronous>, transform_indices = @transform_1, window_bounds = array<i64: 36, 8>}, {pipeline_mode = #tpu.pipeline_mode<synchronous>, transform_indices = @transform_2, window_bounds = array<i64: 1, 8>}, {pipeline_mode = #tpu.pipeline_mode<synchronous>, transform_indices = @transform_3, window_bounds = array<i64: 1, 8>}, {pipeline_mode = #tpu.pipeline_mode<synchronous>, transform_indices = @transform_4, window_bounds = array<i64: 128, 8>}]} {
    %c0 = arith.constant 0 : index
    %c0_0 = arith.constant 0 : index
    %0 = vector.load %arg1[%c0, %c0_0] : memref<512x36xf32, #tpu.memory_space<vmem>>, vector<512x36xf32>
    %c0_1 = arith.constant 0 : index
    %c0_2 = arith.constant 0 : index
    %1 = vector.load %arg2[%c0_1, %c0_2] : memref<36x8xf32, #tpu.memory_space<vmem>>, vector<36x8xf32>
    %cst = arith.constant dense<0.000000e+00> : vector<512x8xf32>
    %2 = tpu.matmul %0, %1, %cst {dimension_numbers = #tpu.dot_dimension_numbers<[1], [0], [0], [1], [0, 0, 1, 1], [], []>} : vector<512x36xf32>, vector<36x8xf32>, vector<512x8xf32> -> vector<512x8xf32>
    %3 = vector.extract_strided_slice %2 {offsets = [0, 0], sizes = [128, 8], strides = [1, 1]} : vector<512x8xf32> to vector<128x8xf32>
    %4 = vector.extract_strided_slice %2 {offsets = [128, 0], sizes = [128, 8], strides = [1, 1]} : vector<512x8xf32> to vector<128x8xf32>
    %5 = arith.maximumf %3, %4 : vector<128x8xf32>
    %6 = vector.extract_strided_slice %2 {offsets = [256, 0], sizes = [128, 8], strides = [1, 1]} : vector<512x8xf32> to vector<128x8xf32>
    %7 = arith.maximumf %5, %6 : vector<128x8xf32>
    %8 = vector.extract_strided_slice %2 {offsets = [384, 0], sizes = [128, 8], strides = [1, 1]} : vector<512x8xf32> to vector<128x8xf32>
    %9 = arith.maximumf %7, %8 : vector<128x8xf32>
    %c0_3 = arith.constant 0 : index
    %c0_4 = arith.constant 0 : index
    %10 = vector.load %arg3[%c0_3, %c0_4] : memref<1x8xf32, #tpu.memory_space<vmem>>, vector<1x8xf32>
    %11 = vector.broadcast %10 : vector<1x8xf32> to vector<128x8xf32>
    %12 = arith.mulf %9, %11 : vector<128x8xf32>
    %c0_5 = arith.constant 0 : index
    %c0_6 = arith.constant 0 : index
    %13 = vector.load %arg4[%c0_5, %c0_6] : memref<1x8xf32, #tpu.memory_space<vmem>>, vector<1x8xf32>
    %14 = vector.broadcast %13 : vector<1x8xf32> to vector<128x8xf32>
    %15 = arith.addf %12, %14 : vector<128x8xf32>
    %cst_7 = arith.constant 0.000000e+00 : f32
    %16 = vector.broadcast %cst_7 : f32 to vector<128x8xf32>
    %17 = arith.maximumf %15, %16 : vector<128x8xf32>
    %c0_8 = arith.constant 0 : index
    %c0_9 = arith.constant 0 : index
    %18 = vector.load %arg5[%c0_8, %c0_9] : memref<128x8xf32, #tpu.memory_space<vmem>>, vector<128x8xf32>
    tpu.vector_store %arg5[%c0_8, %c0_9], %17 {strides = array<i32>} : memref<128x8xf32, #tpu.memory_space<vmem>>, vector<128x8xf32>,
    return
  }
  func.func @transform_0(%arg0: i32) -> (i32, i32) {
    %c0_i32 = arith.constant 0 : i32
    %c0_i32_0 = arith.constant 0 : i32
    %c0_i32_1 = arith.constant 0 : i32
    return %c0_i32, %c0_i32_0 : i32, i32
  }
  func.func @transform_1(%arg0: i32) -> (i32, i32) {
    %c0_i32 = arith.constant 0 : i32
    %c0_i32_0 = arith.constant 0 : i32
    %c0_i32_1 = arith.constant 0 : i32
    return %c0_i32, %c0_i32_0 : i32, i32
  }
  func.func @transform_2(%arg0: i32) -> (i32, i32) {
    %c0_i32 = arith.constant 0 : i32
    %c0_i32_0 = arith.constant 0 : i32
    %c0_i32_1 = arith.constant 0 : i32
    return %c0_i32, %c0_i32_0 : i32, i32
  }
  func.func @transform_3(%arg0: i32) -> (i32, i32) {
    %c0_i32 = arith.constant 0 : i32
    %c0_i32_0 = arith.constant 0 : i32
    %c0_i32_1 = arith.constant 0 : i32
    return %c0_i32, %c0_i32_0 : i32, i32
  }
  func.func @transform_4(%arg0: i32) -> (i32, i32) {
    %c0_i32 = arith.constant 0 : i32
    %c0_i32_0 = arith.constant 0 : i32
    %c0_i32_1 = arith.constant 0 : i32
    return %c0_i32, %c0_i32_0 : i32, i32
  }
}

module attributes {stable_mosaic.version = 11 : i64} {
  func.func @mlp_kernel(%arg0: i32, %arg1: memref<2x512xf32, #tpu.memory_space<vmem>>, %arg2: memref<512x32xf32, #tpu.memory_space<vmem>>, %arg3: memref<1x32xf32, #tpu.memory_space<vmem>>, %arg4: memref<32x128xf32, #tpu.memory_space<vmem>>, %arg5: memref<1x128xf32, #tpu.memory_space<vmem>>, %arg6: memref<2x128xf32, #tpu.memory_space<vmem>>) attributes {dimension_semantics = [#tpu.dimension_semantics<arbitrary>], iteration_bounds = array<i64: 1>, scalar_prefetch = 0 : i64, scratch_operands = 0 : i64, tpu.core_type = #tpu.core_type<tc>, window_params = [{pipeline_mode = #tpu.pipeline_mode<synchronous>, transform_indices = @transform_0, window_bounds = array<i64: 2, 512>}, {pipeline_mode = #tpu.pipeline_mode<synchronous>, transform_indices = @transform_1, window_bounds = array<i64: 512, 32>}, {pipeline_mode = #tpu.pipeline_mode<synchronous>, transform_indices = @transform_2, window_bounds = array<i64: 1, 32>}, {pipeline_mode = #tpu.pipeline_mode<synchronous>, transform_indices = @transform_3, window_bounds = array<i64: 32, 128>}, {pipeline_mode = #tpu.pipeline_mode<synchronous>, transform_indices = @transform_4, window_bounds = array<i64: 1, 128>}, {pipeline_mode = #tpu.pipeline_mode<synchronous>, transform_indices = @transform_5, window_bounds = array<i64: 2, 128>}]} {
    %c0 = arith.constant 0 : index
    %c0_0 = arith.constant 0 : index
    %0 = vector.load %arg1[%c0, %c0_0] : memref<2x512xf32, #tpu.memory_space<vmem>>, vector<2x512xf32>
    %c0_1 = arith.constant 0 : index
    %c0_2 = arith.constant 0 : index
    %1 = vector.load %arg2[%c0_1, %c0_2] : memref<512x32xf32, #tpu.memory_space<vmem>>, vector<512x32xf32>
    %cst = arith.constant dense<0.000000e+00> : vector<2x32xf32>
    %2 = tpu.matmul %0, %1, %cst {dimension_numbers = #tpu.dot_dimension_numbers<[1], [0], [0], [1], [0, 0, 1, 1], [], []>} : vector<2x512xf32>, vector<512x32xf32>, vector<2x32xf32> -> vector<2x32xf32>
    %c0_3 = arith.constant 0 : index
    %c0_4 = arith.constant 0 : index
    %3 = vector.load %arg3[%c0_3, %c0_4] : memref<1x32xf32, #tpu.memory_space<vmem>>, vector<1x32xf32>
    %4 = vector.broadcast %3 : vector<1x32xf32> to vector<2x32xf32>
    %5 = arith.addf %2, %4 : vector<2x32xf32>
    %cst_5 = arith.constant 0.000000e+00 : f32
    %6 = vector.broadcast %cst_5 : f32 to vector<2x32xf32>
    %7 = arith.maximumf %5, %6 : vector<2x32xf32>
    %c0_6 = arith.constant 0 : index
    %c0_7 = arith.constant 0 : index
    %8 = vector.load %arg4[%c0_6, %c0_7] : memref<32x128xf32, #tpu.memory_space<vmem>>, vector<32x128xf32>
    %cst_8 = arith.constant dense<0.000000e+00> : vector<2x128xf32>
    %9 = tpu.matmul %7, %8, %cst_8 {dimension_numbers = #tpu.dot_dimension_numbers<[1], [0], [0], [1], [0, 0, 1, 1], [], []>} : vector<2x32xf32>, vector<32x128xf32>, vector<2x128xf32> -> vector<2x128xf32>
    %c0_9 = arith.constant 0 : index
    %c0_10 = arith.constant 0 : index
    %10 = vector.load %arg5[%c0_9, %c0_10] : memref<1x128xf32, #tpu.memory_space<vmem>>, vector<1x128xf32>
    %11 = vector.broadcast %10 : vector<1x128xf32> to vector<2x128xf32>
    %12 = arith.addf %9, %11 : vector<2x128xf32>
    %cst_11 = arith.constant 0.000000e+00 : f32
    %13 = vector.broadcast %cst_11 : f32 to vector<2x128xf32>
    %14 = arith.maximumf %12, %13 : vector<2x128xf32>
    %c0_12 = arith.constant 0 : index
    %c0_13 = arith.constant 0 : index
    %15 = vector.load %arg6[%c0_12, %c0_13] : memref<2x128xf32, #tpu.memory_space<vmem>>, vector<2x128xf32>
    tpu.vector_store %arg6[%c0_12, %c0_13], %14 {strides = array<i32>} : memref<2x128xf32, #tpu.memory_space<vmem>>, vector<2x128xf32>,
    return
  }
  func.func @transform_0(%arg0: i32) -> (i32, i32) {
    %c0_i32 = arith.constant 0 : i32
    %c0_i32_0 = arith.constant 0 : i32
    %c0_i32_1 = arith.constant 0 : i32
    return %c0_i32, %c0_i32_0 : i32, i32
  }
  func.func @transform_1(%arg0: i32) -> (i32, i32) {
    %c0_i32 = arith.constant 0 : i32
    %c0_i32_0 = arith.constant 0 : i32
    %c0_i32_1 = arith.constant 0 : i32
    return %c0_i32, %c0_i32_0 : i32, i32
  }
  func.func @transform_2(%arg0: i32) -> (i32, i32) {
    %c0_i32 = arith.constant 0 : i32
    %c0_i32_0 = arith.constant 0 : i32
    %c0_i32_1 = arith.constant 0 : i32
    return %c0_i32, %c0_i32_0 : i32, i32
  }
  func.func @transform_3(%arg0: i32) -> (i32, i32) {
    %c0_i32 = arith.constant 0 : i32
    %c0_i32_0 = arith.constant 0 : i32
    %c0_i32_1 = arith.constant 0 : i32
    return %c0_i32, %c0_i32_0 : i32, i32
  }
  func.func @transform_4(%arg0: i32) -> (i32, i32) {
    %c0_i32 = arith.constant 0 : i32
    %c0_i32_0 = arith.constant 0 : i32
    %c0_i32_1 = arith.constant 0 : i32
    return %c0_i32, %c0_i32_0 : i32, i32
  }
  func.func @transform_5(%arg0: i32) -> (i32, i32) {
    %c0_i32 = arith.constant 0 : i32
    %c0_i32_0 = arith.constant 0 : i32
    %c0_i32_1 = arith.constant 0 : i32
    return %c0_i32, %c0_i32_0 : i32, i32
  }
}

</mosaic_0001>

<bundles_post_ra>
// kernel: resnet_forward.2
= control target key start
LH: loop header
LB: loop body
LE: loop exit
PB: predicated region body
PF: predicated region fallthrough
CT: control target
= control target key end

     0   :  { %vm86_vm0 = vcmask 293888   ;;  %vm279_vm1 = vcmask 1043456   ;;  %vm778_vm2 = vcmask 64512   ;;  %s1526_s1 = inlined_call_operand.vmem [shape: f32[36,8], index: 1, kind: input, shape index: {}]   ;;  %s1527_s0 = inlined_call_operand.vmem [shape: f32[512,36], index: 0, kind: input, shape index: {}]   ;;  %s1528_s2 = inlined_call_operand.vmem [shape: f32[1,8], index: 2, kind: input, shape index: {}]   ;;  %s1529_s3 = inlined_call_operand.vmem [shape: f32[1,8], index: 3, kind: input, shape index: {}]   ;;  %s1530_s4 = inlined_call_operand.vmem [shape: f32[128,8], index: 4, kind: output, shape index: {}]  }
   0x1   :  { %v81_v0 = vld [vmem:[%s1526_s1] sm:$0xff]  ;;  %v82_v1 = vld [vmem:[%s1526_s1 + $0x8] sm:$0xff]  ;;  %v83_v2 = vld [vmem:[%s1526_s1 + $0x10] sm:$0xff] }
   0x2   :  { %v1041_v3 = vpack.c.bf16 %v82_v1, %v81_v0  ;;  %v84_v4 = vld [vmem:[%s1526_s1 + $0x18] sm:$0xff]  ;;  %v17_v5 = vld [vmem:[%s1527_s0] sm:$0xff]  ;;  %v18_v9 = vld [vmem:[%s1527_s0 + $0x8] sm:$0xff] }
   0x3   :  { %v1045_v6 = vpack.c.bf16 %v84_v4, %v83_v2  ;;  %945 = vmatprep.mubr.msk.f32.mxu0 %vm86_vm0, %v17_v5  ;;  %v49_v7 = vld [vmem:[%s1527_s0 + $0x100] sm:$0xff]  ;;  %v50_v10 = vld [vmem:[%s1527_s0 + $0x108] sm:$0xff]  ;;  %v19_v11 = vld [vmem:[%s1527_s0 + $0x10] sm:$0xff] }
   0x4   :  { %1042 = vmatprep.subr.bf16.mxu0 %v1041_v3  ;;  %1049 = vmatprep.subr.bf16.mxu1 %v1041_v3  ;;  %v85_v8 = vld [vmem:[%s1526_s1 + $0x20] sm:$0xf]  ;;  %v51_v12 = vld [vmem:[%s1527_s0 + $0x110] sm:$0xff]  ;;  %v20_v13 = vld [vmem:[%s1527_s0 + $0x18] sm:$0xff] }
   0x5   :  { %1044 = vmatpush3.bf16.msra.mxu0 %v1041_v3  ;;  %1052 = vmatpush3.bf16.msra.mxu1 %v1041_v3  ;;  %v52_v14 = vld [vmem:[%s1527_s0 + $0x118] sm:$0xff]  ;;  %v21_v15 = vld [vmem:[%s1527_s0 + $0x20] sm:$0xff]  ;;  %v22_v17 = vld [vmem:[%s1527_s0 + $0x28] sm:$0xff] }
   0x6   :  { %1046 = vmatprep.subr.bf16.mxu0 %v1045_v6  ;;  %1050 = vmatprep.subr.bf16.mxu1 %v1045_v6  ;;  %v53_v16 = vld [vmem:[%s1527_s0 + $0x120] sm:$0xff]  ;;  %v54_v18 = vld [vmem:[%s1527_s0 + $0x128] sm:$0xff]  ;;  %v23_v19 = vld [vmem:[%s1527_s0 + $0x30] sm:$0xff] }
   0x7   :  { %993 = vmatprep.mubr.msk.f32.mxu1 %vm86_vm0, %v49_v7  ;;  %v55_v20 = vld [vmem:[%s1527_s0 + $0x130] sm:$0xff]  ;;  %v24_v21 = vld [vmem:[%s1527_s0 + $0x38] sm:$0xff]  ;;  %v25_v23 = vld [vmem:[%s1527_s0 + $0x40] sm:$0xff] }
   0x8   :  { %v56_v22 = vld [vmem:[%s1527_s0 + $0x138] sm:$0xff]  ;;  %v57_v24 = vld [vmem:[%s1527_s0 + $0x140] sm:$0xff]  ;;  %v26_v25 = vld [vmem:[%s1527_s0 + $0x48] sm:$0xff] }
   0x9   :  { %1048 = vmatpush3.bf16.msra.mxu0 %v1045_v6  ;;  %1053 = vmatpush3.bf16.msra.mxu1 %v1045_v6  ;;  %v58_v26 = vld [vmem:[%s1527_s0 + $0x148] sm:$0xff]  ;;  %v27_v27 = vld [vmem:[%s1527_s0 + $0x50] sm:$0xff]  ;;  %v28_v29 = vld [vmem:[%s1527_s0 + $0x58] sm:$0xff] }
   0xa   :  { %943 = vmatprep.subr.msk.mxu0 %vm279_vm1, %v85_v8  ;;  %1051 = vmatprep.subr.msk.mxu1 %vm279_vm1, %v85_v8  ;;  %v59_v28 = vld [vmem:[%s1527_s0 + $0x150] sm:$0xff]  ;;  %v60_v30 = vld [vmem:[%s1527_s0 + $0x158] sm:$0xff]  ;;  %v29_v31 = vld [vmem:[%s1527_s0 + $0x60] sm:$0xff] }
   0xb   :  { %v61_v32 = vld [vmem:[%s1527_s0 + $0x160] sm:$0xff]  ;;  %v30_v33 = vld [vmem:[%s1527_s0 + $0x68] sm:$0xff]  ;;  %v31_v35 = vld [vmem:[%s1527_s0 + $0x70] sm:$0xff] }
   0xc   :  { %v62_v34 = vld [vmem:[%s1527_s0 + $0x168] sm:$0xff]  ;;  %v63_v36 = vld [vmem:[%s1527_s0 + $0x170] sm:$0xff]  ;;  %v32_v37 = vld [vmem:[%s1527_s0 + $0x78] sm:$0xff] }
   0xd   :  { %944 = vmatpush3.msk.msra.mxu0 %vm279_vm1, %v85_v8  ;;  %1054 = vmatpush3.msk.msra.mxu1 %vm279_vm1, %v85_v8  ;;  %v64_v38 = vld [vmem:[%s1527_s0 + $0x178] sm:$0xff]  ;;  %v33_v39 = vld [vmem:[%s1527_s0 + $0x80] sm:$0xff]  ;;  %v34_v41 = vld [vmem:[%s1527_s0 + $0x88] sm:$0xff] }
   0xe   :  { %946 = vmatmul.mubr.msk.f32.vlgmr.msra.gmra.mrb[0].mxu0 %vm86_vm0, %v18_v9  ;;  %994 = vmatmul.mubr.msk.f32.vlgmr.msra.gmra.mrb[0].mxu1 %vm86_vm0, %v50_v10  ;;  %v65_v40 = vld [vmem:[%s1527_s0 + $0x180] sm:$0xff]  ;;  %v66_v42 = vld [vmem:[%s1527_s0 + $0x188] sm:$0xff]  ;;  %v35_v43 = vld [vmem:[%s1527_s0 + $0x90] sm:$0xff] }
   0xf   :  { %948 = vmatprep.mubr.msk.f32.mxu0 %vm86_vm0, %v19_v11  ;;  %996 = vmatprep.mubr.msk.f32.mxu1 %vm86_vm0, %v51_v12  ;;  %v67_v44 = vld [vmem:[%s1527_s0 + $0x190] sm:$0xff]  ;;  %v36_v45 = vld [vmem:[%s1527_s0 + $0x98] sm:$0xff]  ;;  %v37_v47 = vld [vmem:[%s1527_s0 + $0xa0] sm:$0xff] }
  0x10   :  { %v68_v46 = vld [vmem:[%s1527_s0 + $0x198] sm:$0xff]  ;;  %v69_v48 = vld [vmem:[%s1527_s0 + $0x1a0] sm:$0xff]  ;;  %v38_v49 = vld [vmem:[%s1527_s0 + $0xa8] sm:$0xff] }
  0x11   :  { %v70_v50 = vld [vmem:[%s1527_s0 + $0x1a8] sm:$0xff]  ;;  %v39_v51 = vld [vmem:[%s1527_s0 + $0xb0] sm:$0xff]  ;;  %v40_v53 = vld [vmem:[%s1527_s0 + $0xb8] sm:$0xff] }
  0x12   :  { %949 = vmatmul.mubr.msk.f32.gmra.mrb[2].mxu0 %vm86_vm0, %v20_v13  ;;  %997 = vmatmul.mubr.msk.f32.gmra.mrb[2].mxu1 %vm86_vm0, %v52_v14  ;;  %v71_v52 = vld [vmem:[%s1527_s0 + $0x1b0] sm:$0xff]  ;;  %v72_v54 = vld [vmem:[%s1527_s0 + $0x1b8] sm:$0xff]  ;;  %v41_v55 = vld [vmem:[%s1527_s0 + $0xc0] sm:$0xff] }
  0x13   :  { %951 = vmatprep.mubr.msk.f32.mxu0 %vm86_vm0, %v21_v15  ;;  %999 = vmatprep.mubr.msk.f32.mxu1 %vm86_vm0, %v53_v16  ;;  %v73_v56 = vld [vmem:[%s1527_s0 + $0x1c0] sm:$0xff]  ;;  %v42_v57 = vld [vmem:[%s1527_s0 + $0xc8] sm:$0xff]  ;;  %v43_v59 = vld [vmem:[%s1527_s0 + $0xd0] sm:$0xff] }
  0x14   :  { %v74_v58 = vld [vmem:[%s1527_s0 + $0x1c8] sm:$0xff]  ;;  %v75_v60 = vld [vmem:[%s1527_s0 + $0x1d0] sm:$0xff]  ;;  %v44_v61 = vld [vmem:[%s1527_s0 + $0xd8] sm:$0xff] }
  0x15   :  { %v76_v62 = vld [vmem:[%s1527_s0 + $0x1d8] sm:$0xff]  ;;  %v45_v63 = vld [vmem:[%s1527_s0 + $0xe0] sm:$0xff]  ;;  %v46_v1 = vld [vmem:[%s1527_s0 + $0xe8] sm:$0xff] }
  0x16   :  { %952 = vmatmul.mubr.msk.f32.gmra.mrb[4].mxu0 %vm86_vm0, %v22_v17  ;;  %1000 = vmatmul.mubr.msk.f32.gmra.mrb[4].mxu1 %vm86_vm0, %v54_v18  ;;  %v77_v0 = vld [vmem:[%s1527_s0 + $0x1e0] sm:$0xff]  ;;  %v78_v2 = vld [vmem:[%s1527_s0 + $0x1e8] sm:$0xff]  ;;  %v47_v3 = vld [vmem:[%s1527_s0 + $0xf0] sm:$0xff] }
  0x17   :  { %954 = vmatprep.mubr.msk.f32.mxu0 %vm86_vm0, %v23_v19  ;;  %1002 = vmatprep.mubr.msk.f32.mxu1 %vm86_vm0, %v55_v20  ;;  %v79_v4 = vld [vmem:[%s1527_s0 + $0x1f0] sm:$0xff]  ;;  %v48_v5 = vld [vmem:[%s1527_s0 + $0xf8] sm:$0xff] }
  0x18   :  { %v80_v6 = vld [vmem:[%s1527_s0 + $0x1f8] sm:$0xff] }
  0x1a   :  { %955 = vmatmul.mubr.msk.f32.gmra.mrb[6].mxu0 %vm86_vm0, %v24_v21  ;;  %1003 = vmatmul.mubr.msk.f32.gmra.mrb[6].mxu1 %vm86_vm0, %v56_v22 }
  0x1b   :  { %957 = vmatprep.mubr.msk.f32.mxu0 %vm86_vm0, %v25_v23  ;;  %1005 = vmatprep.mubr.msk.f32.mxu1 %vm86_vm0, %v57_v24 }
  0x1e   :  { %958 = vmatmul.mubr.msk.f32.gmra.mrb[8].mxu0 %vm86_vm0, %v26_v25  ;;  %1006 = vmatmul.mubr.msk.f32.gmra.mrb[8].mxu1 %vm86_vm0, %v58_v26 }
  0x1f   :  { %960 = vmatprep.mubr.msk.f32.mxu0 %vm86_vm0, %v27_v27  ;;  %1008 = vmatprep.mubr.msk.f32.mxu1 %vm86_vm0, %v59_v28 }
  0x22   :  { %961 = vmatmul.mubr.msk.f32.gmra.mrb[10].mxu0 %vm86_vm0, %v28_v29  ;;  %1009 = vmatmul.mubr.msk.f32.gmra.mrb[10].mxu1 %vm86_vm0, %v60_v30 }
  0x23   :  { %963 = vmatprep.mubr.msk.f32.mxu0 %vm86_vm0, %v29_v31  ;;  %1011 = vmatprep.mubr.msk.f32.mxu1 %vm86_vm0, %v61_v32 }
  0x26   :  { %964 = vmatmul.mubr.msk.f32.gmra.mrb[12].mxu0 %vm86_vm0, %v30_v33  ;;  %1012 = vmatmul.mubr.msk.f32.gmra.mrb[12].mxu1 %vm86_vm0, %v62_v34 }
  0x27   :  { %966 = vmatprep.mubr.msk.f32.mxu0 %vm86_vm0, %v31_v35  ;;  %1014 = vmatprep.mubr.msk.f32.mxu1 %vm86_vm0, %v63_v36 }
  0x2a   :  { %967 = vmatmul.mubr.msk.f32.gmra.mrb[14].mxu0 %vm86_vm0, %v32_v37  ;;  %1015 = vmatmul.mubr.msk.f32.gmra.mrb[14].mxu1 %vm86_vm0, %v64_v38 }
  0x2b   :  { %969 = vmatprep.mubr.msk.f32.mxu0 %vm86_vm0, %v33_v39  ;;  %1017 = vmatprep.mubr.msk.f32.mxu1 %vm86_vm0, %v65_v40 }
  0x2e   :  { %970 = vmatmul.mubr.msk.f32.gmra.mrb[16].mxu0 %vm86_vm0, %v34_v41  ;;  %1018 = vmatmul.mubr.msk.f32.gmra.mrb[16].mxu1 %vm86_vm0, %v66_v42 }
  0x2f   :  { %972 = vmatprep.mubr.msk.f32.mxu0 %vm86_vm0, %v35_v43  ;;  %1020 = vmatprep.mubr.msk.f32.mxu1 %vm86_vm0, %v67_v44 }
  0x32   :  { %973 = vmatmul.mubr.msk.f32.gmra.mrb[18].mxu0 %vm86_vm0, %v36_v45  ;;  %1021 = vmatmul.mubr.msk.f32.gmra.mrb[18].mxu1 %vm86_vm0, %v68_v46  ;;  %v1400_v46 = vld [vmem:[%s1528_s2] ss:$0 sm:$0xff] }
  0x33   :  { %975 = vmatprep.mubr.msk.f32.mxu0 %vm86_vm0, %v37_v47  ;;  %1023 = vmatprep.mubr.msk.f32.mxu1 %vm86_vm0, %v69_v48 }
  0x36   :  { %976 = vmatmul.mubr.msk.f32.gmra.mrb[20].mxu0 %vm86_vm0, %v38_v49  ;;  %1024 = vmatmul.mubr.msk.f32.gmra.mrb[20].mxu1 %vm86_vm0, %v70_v50 }
  0x37   :  { %978 = vmatprep.mubr.msk.f32.mxu0 %vm86_vm0, %v39_v51  ;;  %1026 = vmatprep.mubr.msk.f32.mxu1 %vm86_vm0, %v71_v52 }
  0x3a   :  { %979 = vmatmul.mubr.msk.f32.gmra.mrb[22].mxu0 %vm86_vm0, %v40_v53  ;;  %1027 = vmatmul.mubr.msk.f32.gmra.mrb[22].mxu1 %vm86_vm0, %v72_v54  ;;  %v1405_v54 = vld [vmem:[%s1529_s3] ss:$0 sm:$0xff] }
  0x3b   :  { %981 = vmatprep.mubr.msk.f32.mxu0 %vm86_vm0, %v41_v55  ;;  %1029 = vmatprep.mubr.msk.f32.mxu1 %vm86_vm0, %v73_v56 }
  0x3e   :  { %982 = vmatmul.mubr.msk.f32.gmra.mrb[24].mxu0 %vm86_vm0, %v42_v57  ;;  %1030 = vmatmul.mubr.msk.f32.gmra.mrb[24].mxu1 %vm86_vm0, %v74_v58 }
  0x3f   :  { %984 = vmatprep.mubr.msk.f32.mxu0 %vm86_vm0, %v43_v59  ;;  %1032 = vmatprep.mubr.msk.f32.mxu1 %vm86_vm0, %v75_v60 }
  0x42   :  { %985 = vmatmul.mubr.msk.f32.gmra.mrb[26].mxu0 %vm86_vm0, %v44_v61  ;;  %1033 = vmatmul.mubr.msk.f32.gmra.mrb[26].mxu1 %vm86_vm0, %v76_v62 }
  0x43   :  { %987 = vmatprep.mubr.msk.f32.mxu0 %vm86_vm0, %v45_v63  ;;  %1035 = vmatprep.mubr.msk.f32.mxu1 %vm86_vm0, %v77_v0 }
  0x46   :  { %988 = vmatmul.mubr.msk.f32.gmra.mrb[28].mxu0 %vm86_vm0, %v46_v1  ;;  %1036 = vmatmul.mubr.msk.f32.gmra.mrb[28].mxu1 %vm86_vm0, %v78_v2 }
  0x47   :  { %990 = vmatprep.mubr.msk.f32.mxu0 %vm86_vm0, %v47_v3  ;;  %1038 = vmatprep.mubr.msk.f32.mxu1 %vm86_vm0, %v79_v4 }
  0x4a   :  { %991 = vmatmul.mubr.msk.f32.gmra.mrb[30].mxu0 %vm86_vm0, %v48_v5  ;;  %1039 = vmatmul.mubr.msk.f32.gmra.mrb[30].mxu1 %vm86_vm0, %v80_v6 }
  0xe1   :  { %v947_v7 = vpop.f32.mrb[0].mxu0  ;;  %v995_v8 = vpop.f32.mrb[0].mxu1 }
  0xe2   :  { %v349_v9 = vpop.f32.mrb[1].mxu0  ;;  %v509_v10 = vpop.f32.mrb[1].mxu1 }
  0xe5   :  { %v950_v11 = vpop.f32.mrb[2].mxu0  ;;  %v998_v12 = vpop.f32.mrb[2].mxu1 }
  0xe6   :  { %v359_v13 = vpop.f32.mrb[3].mxu0  ;;  %v519_v14 = vpop.f32.mrb[3].mxu1 }
  0xe9   :  { %v1351_v15 = vpop.f32.mrb[4].mxu0  ;;  %v1001_v16 = vpop.f32.mrb[4].mxu1 }
  0xea   :  { %v1353_v17 = vpop.f32.mrb[5].mxu0  ;;  %v1355_v18 = vpop.f32.mrb[5].mxu1 }
  0xed   :  { %v1357_v19 = vpop.f32.mrb[6].mxu0  ;;  %v1359_v20 = vpop.f32.mrb[6].mxu1 }
  0xee   :  { %v1361_v21 = vpop.f32.mrb[7].mxu0  ;;  %v1363_v22 = vpop.f32.mrb[7].mxu1 }
  0xf1   :  { %v1365_v23 = vpop.f32.mrb[8].mxu0  ;;  %v1367_v24 = vpop.f32.mrb[8].mxu1 }
  0xf2   :  { %v1369_v25 = vpop.f32.mrb[9].mxu0  ;;  %v1371_v26 = vpop.f32.mrb[9].mxu1 }
  0xf5   :  { %v1373_v27 = vpop.f32.mrb[10].mxu0  ;;  %v1375_v28 = vpop.f32.mrb[10].mxu1 }
  0xf6   :  { %v1377_v29 = vpop.f32.mrb[11].mxu0  ;;  %v1379_v30 = vpop.f32.mrb[11].mxu1 }
  0xf9   :  { %v1381_v31 = vpop.f32.mrb[12].mxu0  ;;  %v1383_v32 = vpop.f32.mrb[12].mxu1 }
  0xfa   :  { %v1385_v33 = vpop.f32.mrb[13].mxu0  ;;  %v1387_v34 = vpop.f32.mrb[13].mxu1 }
  0xfd   :  { %v1389_v35 = vpop.f32.mrb[14].mxu0  ;;  %v1391_v36 = vpop.f32.mrb[14].mxu1 }
  0xfe   :  { %v1393_v37 = vpop.f32.mrb[15].mxu0  ;;  %v1395_v38 = vpop.f32.mrb[15].mxu1 }
 0x101   :  { %v971_v39 = vpop.f32.mrb[16].mxu0  ;;  %v1019_v40 = vpop.f32.mrb[16].mxu1 }
 0x102   :  { %v669_v41 = vmax.f32 %v947_v7, %v971_v39  ;;  %v429_v42 = vpop.f32.mrb[17].mxu0  ;;  %v589_v43 = vpop.f32.mrb[17].mxu1 }
 0x103   :  { %v668_v44 = vmax.f32 %v349_v9, %v429_v42 }
 0x104   :  { %v685_v45 = vmax.f32 %v669_v41, %v995_v8 }
 0x105   :  { %v974_v47 = vpop.f32.mrb[18].mxu0  ;;  %v684_v48 = vmax.f32 %v668_v44, %v509_v10  ;;  %v1022_v49 = vpop.f32.mrb[18].mxu1 }
 0x106   :  { %v701_v50 = vmax.f32 %v685_v45, %v1019_v40  ;;  %v671_v51 = vmax.f32 %v950_v11, %v974_v47  ;;  %v439_v52 = vpop.f32.mrb[19].mxu0  ;;  %v599_v53 = vpop.f32.mrb[19].mxu1 }
 0x107   :  { %v700_v55 = vmax.f32 %v684_v48, %v589_v43  ;;  %v670_v56 = vmax.f32 %v359_v13, %v439_v52 }
 0x108   :  { %v724_v57 = vmul.f32 %v1400_v46, %v701_v50  ;;  %v687_v58 = vmax.f32 %v671_v51, %v998_v12 }
 0x109   :  { %v723_v59 = vmul.f32 %v1400_v46, %v700_v55  ;;  %v977_v60 = vpop.f32.mrb[20].mxu0  ;;  %v686_v61 = vmax.f32 %v670_v56, %v519_v14  ;;  %v1025_v62 = vpop.f32.mrb[20].mxu1 }
 0x10a   :  { %v747_v63 = vadd.f32 %v1405_v54, %v724_v57  ;;  %v703_v0 = vmax.f32 %v687_v58, %v1022_v49  ;;  %v673_v1 = vmax.f32 %v1351_v15, %v977_v60  ;;  %v449_v2 = vpop.f32.mrb[21].mxu0  ;;  %v609_v3 = vpop.f32.mrb[21].mxu1 }
 0x10b   :  { %v746_v4 = vadd.f32 %v1405_v54, %v723_v59  ;;  %v702_v5 = vmax.f32 %v686_v61, %v599_v53  ;;  %v672_v6 = vmax.f32 %v1353_v17, %v449_v2 }
 0x10c   :  { %v763_v7 = vmax.f32 %v747_v63, 0.0  ;;  %v726_v8 = vmul.f32 %v1400_v46, %v703_v0  ;;  %v689_v9 = vmax.f32 %v673_v1, %v1001_v16 }
 0x10d   :  { %v762_v10 = vmax.f32 %v746_v4, 0.0  ;;  %v725_v11 = vmul.f32 %v1400_v46, %v702_v5  ;;  %v980_v12 = vpop.f32.mrb[22].mxu0  ;;  %v688_v13 = vmax.f32 %v672_v6, %v1355_v18  ;;  %v1028_v14 = vpop.f32.mrb[22].mxu1 }
 0x10e   :  { %780 = vst.msk [vmem:[%s1530_s4 + $0x8] sm:$0xff] %vm778_vm2, %v763_v7  ;;  %v749_v15 = vadd.f32 %v1405_v54, %v726_v8  ;;  %v705_v39 = vmax.f32 %v689_v9, %v1025_v62  ;;  %v675_v17 = vmax.f32 %v1357_v19, %v980_v12  ;;  %v459_v40 = vpop.f32.mrb[23].mxu0  ;;  %v619_v41 = vpop.f32.mrb[23].mxu1 }
 0x10f   :  { %779 = vst.msk [vmem:[%s1530_s4] sm:$0xff] %vm778_vm2, %v762_v10  ;;  %v748_v16 = vadd.f32 %v1405_v54, %v725_v11  ;;  %v704_v18 = vmax.f32 %v688_v13, %v609_v3  ;;  %v674_v42 = vmax.f32 %v1361_v21, %v459_v40 }
 0x110   :  { %v765_v43 = vmax.f32 %v749_v15, 0.0  ;;  %v728_v44 = vmul.f32 %v1400_v46, %v705_v39  ;;  %v691_v45 = vmax.f32 %v675_v17, %v1359_v20 }
 0x111   :  { %v764_v47 = vmax.f32 %v748_v16, 0.0  ;;  %v727_v19 = vmul.f32 %v1400_v46, %v704_v18  ;;  %v983_v48 = vpop.f32.mrb[24].mxu0  ;;  %v690_v49 = vmax.f32 %v674_v42, %v1363_v22  ;;  %v1031_v50 = vpop.f32.mrb[24].mxu1 }
 0x112   :  { %782 = vst.msk [vmem:[%s1530_s4 + $0x18] sm:$0xff] %vm778_vm2, %v765_v43  ;;  %v751_v51 = vadd.f32 %v1405_v54, %v728_v44  ;;  %v707_v21 = vmax.f32 %v691_v45, %v1028_v14  ;;  %v677_v52 = vmax.f32 %v1365_v23, %v983_v48  ;;  %v469_v53 = vpop.f32.mrb[25].mxu0  ;;  %v629_v55 = vpop.f32.mrb[25].mxu1 }
 0x113   :  { %781 = vst.msk [vmem:[%s1530_s4 + $0x10] sm:$0xff] %vm778_vm2, %v764_v47  ;;  %v750_v20 = vadd.f32 %v1405_v54, %v727_v19  ;;  %v706_v22 = vmax.f32 %v690_v49, %v619_v41  ;;  %v676_v56 = vmax.f32 %v1369_v25, %v469_v53 }
 0x114   :  { %v767_v57 = vmax.f32 %v751_v51, 0.0  ;;  %v730_v58 = vmul.f32 %v1400_v46, %v707_v21  ;;  %v693_v59 = vmax.f32 %v677_v52, %v1367_v24 }
 0x115   :  { %v766_v60 = vmax.f32 %v750_v20, 0.0  ;;  %v729_v23 = vmul.f32 %v1400_v46, %v706_v22  ;;  %v986_v61 = vpop.f32.mrb[26].mxu0  ;;  %v692_v62 = vmax.f32 %v676_v56, %v1371_v26  ;;  %v1034_v63 = vpop.f32.mrb[26].mxu1 }
 0x116   :  { %784 = vst.msk [vmem:[%s1530_s4 + $0x28] sm:$0xff] %vm778_vm2, %v767_v57  ;;  %v753_v0 = vadd.f32 %v1405_v54, %v730_v58  ;;  %v709_v25 = vmax.f32 %v693_v59, %v1031_v50  ;;  %v679_v1 = vmax.f32 %v1373_v27, %v986_v61  ;;  %v479_v2 = vpop.f32.mrb[27].mxu0  ;;  %v639_v3 = vpop.f32.mrb[27].mxu1 }
 0x117   :  { %783 = vst.msk [vmem:[%s1530_s4 + $0x20] sm:$0xff] %vm778_vm2, %v766_v60  ;;  %v752_v24 = vadd.f32 %v1405_v54, %v729_v23  ;;  %v708_v26 = vmax.f32 %v692_v62, %v629_v55  ;;  %v678_v4 = vmax.f32 %v1377_v29, %v479_v2 }
 0x118   :  { %v769_v5 = vmax.f32 %v753_v0, 0.0  ;;  %v732_v6 = vmul.f32 %v1400_v46, %v709_v25  ;;  %v695_v7 = vmax.f32 %v679_v1, %v1375_v28 }
 0x119   :  { %v768_v8 = vmax.f32 %v752_v24, 0.0  ;;  %v731_v27 = vmul.f32 %v1400_v46, %v708_v26  ;;  %v989_v9 = vpop.f32.mrb[28].mxu0  ;;  %v694_v10 = vmax.f32 %v678_v4, %v1379_v30  ;;  %v1037_v11 = vpop.f32.mrb[28].mxu1 }
 0x11a   :  { %786 = vst.msk [vmem:[%s1530_s4 + $0x38] sm:$0xff] %vm778_vm2, %v769_v5  ;;  %v755_v12 = vadd.f32 %v1405_v54, %v732_v6  ;;  %v711_v29 = vmax.f32 %v695_v7, %v1034_v63  ;;  %v681_v13 = vmax.f32 %v1381_v31, %v989_v9  ;;  %v489_v14 = vpop.f32.mrb[29].mxu0  ;;  %v649_v15 = vpop.f32.mrb[29].mxu1 }
 0x11b   :  { %785 = vst.msk [vmem:[%s1530_s4 + $0x30] sm:$0xff] %vm778_vm2, %v768_v8  ;;  %v754_v28 = vadd.f32 %v1405_v54, %v731_v27  ;;  %v710_v30 = vmax.f32 %v694_v10, %v639_v3  ;;  %v680_v39 = vmax.f32 %v1385_v33, %v489_v14 }
 0x11c   :  { %v771_v17 = vmax.f32 %v755_v12, 0.0  ;;  %v734_v40 = vmul.f32 %v1400_v46, %v711_v29  ;;  %v697_v41 = vmax.f32 %v681_v13, %v1383_v32 }
 0x11d   :  { %v770_v16 = vmax.f32 %v754_v28, 0.0  ;;  %v733_v31 = vmul.f32 %v1400_v46, %v710_v30  ;;  %v992_v18 = vpop.f32.mrb[30].mxu0  ;;  %v696_v42 = vmax.f32 %v680_v39, %v1387_v34  ;;  %v1040_v43 = vpop.f32.mrb[30].mxu1 }
 0x11e   :  { %788 = vst.msk [vmem:[%s1530_s4 + $0x48] sm:$0xff] %vm778_vm2, %v771_v17  ;;  %v757_v44 = vadd.f32 %v1405_v54, %v734_v40  ;;  %v713_v33 = vmax.f32 %v697_v41, %v1037_v11  ;;  %v683_v45 = vmax.f32 %v1389_v35, %v992_v18  ;;  %v499_v47 = vpop.f32.mrb[31].mxu0  ;;  %v659_v19 = vpop.f32.mrb[31].mxu1 }
 0x11f   :  { %787 = vst.msk [vmem:[%s1530_s4 + $0x40] sm:$0xff] %vm778_vm2, %v770_v16  ;;  %v756_v32 = vadd.f32 %v1405_v54, %v733_v31  ;;  %v712_v34 = vmax.f32 %v696_v42, %v649_v15  ;;  %v682_v48 = vmax.f32 %v1393_v37, %v499_v47 }
 0x120   :  { %v773_v49 = vmax.f32 %v757_v44, 0.0  ;;  %v736_v50 = vmul.f32 %v1400_v46, %v713_v33  ;;  %v699_v51 = vmax.f32 %v683_v45, %v1391_v36 }
 0x121   :  { %v772_v21 = vmax.f32 %v756_v32, 0.0  ;;  %v735_v35 = vmul.f32 %v1400_v46, %v712_v34  ;;  %v698_v52 = vmax.f32 %v682_v48, %v1395_v38 }
 0x122   :  { %790 = vst.msk [vmem:[%s1530_s4 + $0x58] sm:$0xff] %vm778_vm2, %v773_v49  ;;  %v759_v53 = vadd.f32 %v1405_v54, %v736_v50  ;;  %v715_v55 = vmax.f32 %v699_v51, %v1040_v43 }
 0x123   :  { %789 = vst.msk [vmem:[%s1530_s4 + $0x50] sm:$0xff] %vm778_vm2, %v772_v21  ;;  %v758_v36 = vadd.f32 %v1405_v54, %v735_v35  ;;  %v714_v37 = vmax.f32 %v698_v52, %v659_v19 }
 0x124   :  { %v775_v20 = vmax.f32 %v759_v53, 0.0  ;;  %v738_v22 = vmul.f32 %v1400_v46, %v715_v55 }
 0x125   :  { %v774_v38 = vmax.f32 %v758_v36, 0.0  ;;  %v737_v56 = vmul.f32 %v1400_v46, %v714_v37 }
 0x126   :  { %792 = vst.msk [vmem:[%s1530_s4 + $0x68] sm:$0xff] %vm778_vm2, %v775_v20  ;;  %v761_v57 = vadd.f32 %v1405_v54, %v738_v22 }
 0x127   :  { %791 = vst.msk [vmem:[%s1530_s4 + $0x60] sm:$0xff] %vm778_vm2, %v774_v38  ;;  %v760_v58 = vadd.f32 %v1405_v54, %v737_v56 }
 0x128   :  { %v777_v59 = vmax.f32 %v761_v57, 0.0 }
 0x129   :  { %v776_v60 = vmax.f32 %v760_v58, 0.0 }
 0x12a   :  { %794 = vst.msk [vmem:[%s1530_s4 + $0x78] sm:$0xff] %vm778_vm2, %v777_v59 }
 0x12b   :  { %793 = vst.msk [vmem:[%s1530_s4 + $0x70] sm:$0xff] %vm778_vm2, %v776_v60 }

// kernel: resnet_forward.3
= control target key start
LH: loop header
LB: loop body
LE: loop exit
PB: predicated region body
PF: predicated region fallthrough
CT: control target
= control target key end

     0   :  { %v546_v47 = vmov 1983009808   ;;  %v98_v49 = vlaneseq  ;;  %s806_s0 = inlined_call_operand.vmem [shape: f32[2,512], index: 0, kind: input, shape index: {}]   ;;  %s807_s1 = inlined_call_operand.vmem [shape: f32[512,32], index: 1, kind: input, shape index: {}]   ;;  %s808_s2 = inlined_call_operand.vmem [shape: f32[1,32], index: 2, kind: input, shape index: {}]   ;;  %s809_s3 = inlined_call_operand.vmem [shape: f32[32,128], index: 3, kind: input, shape index: {}]   ;;  %s810_s4 = inlined_call_operand.vmem [shape: f32[1,128], index: 4, kind: input, shape index: {}]   ;;  %s811_s5 = inlined_call_operand.hbm [shape: f32[2,128], index: 5, kind: output, shape index: {}]  }
   0x1   :  { %v38_v0 = vld [vmem:[%s807_s1 + $0x80] sm:$0xff]  ;;  %v39_v1 = vld [vmem:[%s807_s1 + $0x88] sm:$0xff]  ;;  %v40_v11 = vld [vmem:[%s807_s1 + $0x90] sm:$0xff]  ;;  %v96_v48 = vunpack.c.l.s4 %v546_v47 }
   0x2   :  { %v22_v2 = vld [vmem:[%s807_s1] sm:$0xff]  ;;  %v446_v3 = vpack.c.bf16 %v39_v1, %v38_v0  ;;  %v23_v4 = vld [vmem:[%s807_s1 + $0x8] sm:$0xff]  ;;  %v41_v13 = vld [vmem:[%s807_s1 + $0x98] sm:$0xff]  ;;  %v99_v0 = vshrl.u32 %v98_v49, 7 }
   0x3   :  { %v70_v5 = vld [vmem:[%s807_s1 + $0x180] sm:$0xff]  ;;  %v71_v6 = vld [vmem:[%s807_s1 + $0x188] sm:$0xff]  ;;  %v448_v7 = vpack.c.bf16 %v23_v4, %v22_v2  ;;  %v24_v14 = vld [vmem:[%s807_s1 + $0x10] sm:$0xff]  ;;  %v450_v16 = vpack.c.bf16 %v41_v13, %v40_v11  ;;  %v97_v63 = vunpack.c.0.s8 %v96_v48 }
   0x4   :  { %v478_v8 = vpack.c.bf16 %v71_v6, %v70_v5  ;;  %v54_v9 = vld [vmem:[%s807_s1 + $0x100] sm:$0xff]  ;;  %v55_v10 = vld [vmem:[%s807_s1 + $0x108] sm:$0xff]  ;;  %447 = vmatprep.subr.bf16.mxu0 %v446_v3  ;;  %v25_v15 = vld [vmem:[%s807_s1 + $0x18] sm:$0xff] }
   0x5   :  { %v480_v12 = vpack.c.bf16 %v55_v10, %v54_v9  ;;  %449 = vmatpush3.bf16.msra.mxu0 %v448_v7  ;;  %v452_v17 = vpack.c.bf16 %v25_v15, %v24_v14  ;;  %v72_v18 = vld [vmem:[%s807_s1 + $0x190] sm:$0xff]  ;;  %v73_v19 = vld [vmem:[%s807_s1 + $0x198] sm:$0xff]  ;;  %v42_v23 = vld [vmem:[%s807_s1 + $0xa0] sm:$0xff]  ;;  %v100_v13 = vsub.s32 %v97_v63, %v99_v0 }
   0x6   :  { %479 = vmatprep.subr.bf16.mxu1 %v478_v8  ;;  %v56_v20 = vld [vmem:[%s807_s1 + $0x110] sm:$0xff]  ;;  %v482_v21 = vpack.c.bf16 %v73_v19, %v72_v18  ;;  %v57_v22 = vld [vmem:[%s807_s1 + $0x118] sm:$0xff]  ;;  %v43_v24 = vld [vmem:[%s807_s1 + $0xa8] sm:$0xff]  ;;  %451 = vmatprep.subr.bf16.mxu0 %v450_v16 }
   0x7   :  { %481 = vmatpush3.bf16.msra.mxu1 %v480_v12  ;;  %v484_v25 = vpack.c.bf16 %v57_v22, %v56_v20  ;;  %v454_v26 = vpack.c.bf16 %v43_v24, %v42_v23  ;;  %v26_v27 = vld [vmem:[%s807_s1 + $0x20] sm:$0xff]  ;;  %v27_v28 = vld [vmem:[%s807_s1 + $0x28] sm:$0xff]  ;;  %v44_v35 = vld [vmem:[%s807_s1 + $0xb0] sm:$0xff] }
   0x8   :  { %v74_v29 = vld [vmem:[%s807_s1 + $0x1a0] sm:$0xff]  ;;  %483 = vmatprep.subr.bf16.mxu1 %v482_v21  ;;  %v75_v30 = vld [vmem:[%s807_s1 + $0x1a8] sm:$0xff]  ;;  %v456_v33 = vpack.c.bf16 %v27_v28, %v26_v27  ;;  %v45_v36 = vld [vmem:[%s807_s1 + $0xb8] sm:$0xff] }
   0x9   :  { %v58_v31 = vld [vmem:[%s807_s1 + $0x120] sm:$0xff]  ;;  %v59_v32 = vld [vmem:[%s807_s1 + $0x128] sm:$0xff]  ;;  %453 = vmatpush3.bf16.msra.mxu0 %v452_v17  ;;  %v486_v34 = vpack.c.bf16 %v75_v30, %v74_v29  ;;  %v28_v37 = vld [vmem:[%s807_s1 + $0x30] sm:$0xff]  ;;  %v458_v39 = vpack.c.bf16 %v45_v36, %v44_v35 }
   0xa   :  { %455 = vmatprep.subr.bf16.mxu0 %v454_v26  ;;  %v488_v38 = vpack.c.bf16 %v59_v32, %v58_v31  ;;  %v29_v40 = vld [vmem:[%s807_s1 + $0x38] sm:$0xff]  ;;  %v76_v41 = vld [vmem:[%s807_s1 + $0x1b0] sm:$0xff]  ;;  %v46_v46 = vld [vmem:[%s807_s1 + $0xc0] sm:$0xff] }
   0xb   :  { %485 = vmatpush3.bf16.msra.mxu1 %v484_v25  ;;  %v77_v42 = vld [vmem:[%s807_s1 + $0x1b8] sm:$0xff]  ;;  %v60_v44 = vld [vmem:[%s807_s1 + $0x130] sm:$0xff]  ;;  %v47_v50 = vld [vmem:[%s807_s1 + $0xc8] sm:$0xff]  ;;  %v460_v51 = vpack.c.bf16 %v29_v40, %v28_v37 }
   0xc   :  { %487 = vmatprep.subr.bf16.mxu1 %v486_v34  ;;  %v490_v43 = vpack.c.bf16 %v77_v42, %v76_v41  ;;  %v61_v45 = vld [vmem:[%s807_s1 + $0x138] sm:$0xff]  ;;  %v78_v52 = vld [vmem:[%s807_s1 + $0x1c0] sm:$0xff]  ;;  %v79_v53 = vld [vmem:[%s807_s1 + $0x1c8] sm:$0xff]  ;;  %v462_v55 = vpack.c.bf16 %v47_v50, %v46_v46 }
   0xd   :  { %457 = vmatpush3.bf16.msra.mxu0 %v456_v33  ;;  %v492_v54 = vpack.c.bf16 %v61_v45, %v60_v44  ;;  %v30_v56 = vld [vmem:[%s807_s1 + $0x40] sm:$0xff]  ;;  %v31_v57 = vld [vmem:[%s807_s1 + $0x48] sm:$0xff]  ;;  %v494_v59 = vpack.c.bf16 %v79_v53, %v78_v52  ;;  %v48_v61 = vld [vmem:[%s807_s1 + $0xd0] sm:$0xff] }
   0xe   :  { %459 = vmatprep.subr.bf16.mxu0 %v458_v39  ;;  %v62_v58 = vld [vmem:[%s807_s1 + $0x140] sm:$0xff]  ;;  %v63_v60 = vld [vmem:[%s807_s1 + $0x148] sm:$0xff]  ;;  %v49_v62 = vld [vmem:[%s807_s1 + $0xd8] sm:$0xff]  ;;  %v464_v3 = vpack.c.bf16 %v31_v57, %v30_v56 }
   0xf   :  { %489 = vmatpush3.bf16.msra.mxu1 %v488_v38  ;;  %v80_v1 = vld [vmem:[%s807_s1 + $0x1d0] sm:$0xff]  ;;  %v81_v2 = vld [vmem:[%s807_s1 + $0x1d8] sm:$0xff]  ;;  %v496_v4 = vpack.c.bf16 %v63_v60, %v62_v58  ;;  %v466_v5 = vpack.c.bf16 %v49_v62, %v48_v61  ;;  %v50_v11 = vld [vmem:[%s807_s1 + $0xe0] sm:$0xff] }
  0x10   :  { %491 = vmatprep.subr.bf16.mxu1 %v490_v43  ;;  %v32_v6 = vld [vmem:[%s807_s1 + $0x50] sm:$0xff]  ;;  %v33_v7 = vld [vmem:[%s807_s1 + $0x58] sm:$0xff]  ;;  %v498_v9 = vpack.c.bf16 %v81_v2, %v80_v1  ;;  %v51_v12 = vld [vmem:[%s807_s1 + $0xe8] sm:$0xff] }
  0x11   :  { %461 = vmatpush3.bf16.msra.mxu0 %v460_v51  ;;  %v64_v8 = vld [vmem:[%s807_s1 + $0x150] sm:$0xff]  ;;  %v65_v10 = vld [vmem:[%s807_s1 + $0x158] sm:$0xff]  ;;  %v82_v14 = vld [vmem:[%s807_s1 + $0x1e0] sm:$0xff]  ;;  %v468_v16 = vpack.c.bf16 %v33_v7, %v32_v6  ;;  %v470_v20 = vpack.c.bf16 %v51_v12, %v50_v11 }
  0x12   :  { %463 = vmatprep.subr.bf16.mxu0 %v462_v55  ;;  %v83_v15 = vld [vmem:[%s807_s1 + $0x1e8] sm:$0xff]  ;;  %v34_v17 = vld [vmem:[%s807_s1 + $0x60] sm:$0xff]  ;;  %v500_v19 = vpack.c.bf16 %v65_v10, %v64_v8 }
  0x13   :  { %493 = vmatpush3.bf16.msra.mxu1 %v492_v54  ;;  %v35_v18 = vld [vmem:[%s807_s1 + $0x68] sm:$0xff]  ;;  %v66_v21 = vld [vmem:[%s807_s1 + $0x160] sm:$0xff] }
  0x14   :  { %495 = vmatprep.subr.bf16.mxu1 %v494_v59  ;;  %v21_v22 = vld [vmem:[%s806_s0] sm:$0xff] }
  0x15   :  { %465 = vmatpush3.bf16.msra.mxu0 %v464_v3 }
  0x16   :  { %467 = vmatprep.subr.bf16.mxu0 %v466_v5 }
  0x17   :  { %497 = vmatpush3.bf16.msra.mxu1 %v496_v4 }
  0x18   :  { %10 = vsyncpa [#allocation3], 0  ;;  %499 = vmatprep.subr.bf16.mxu1 %v498_v9  ;;  %v502_v23 = vpack.c.bf16 %v83_v15, %v82_v14  ;;  %v67_v24 = vld [vmem:[%s807_s1 + $0x168] sm:$0xff]  ;;  %v52_v25 = vld [vmem:[%s807_s1 + $0xf0] sm:$0xff]  ;;  %v101_v27 = vrot.slane %v21_v22, %v100_v13  ;;  %v94_v28 = vcombine.high %v21_v22, %v21_v22  ;;  %v472_v31 = vpack.c.bf16 %v35_v18, %v34_v17  ;;  %s550_s7 = smov [#allocation2]  }
  0x19   :  { %v53_v26 = vld [vmem:[%s807_s1 + $0xf8] sm:$0xff]  ;;  %v84_v29 = vld [vmem:[%s807_s1 + $0x1f0] sm:$0xff]  ;;  %469 = vmatpush3.bf16.msra.mxu0 %v468_v16  ;;  %v504_v34 = vpack.c.bf16 %v67_v24, %v66_v21  ;;  %v256_v44 = vld [vmem:[%s809_s3] sm:$0xff]  ;;  %v547_v47 = vmov 0.0|0.0   ;;  %vm548_vm0 = vmmov 0   ;;  %v549_v51 = vmov 0.0  }
  0x1a   :  { %v85_v30 = vld [vmem:[%s807_s1 + $0x1f8] sm:$0xff]  ;;  %v109_v32 = vcombine.high %v101_v27, %v101_v27  ;;  %v108_v33 = vrot.slane %v94_v28, %v100_v13  ;;  %471 = vmatprep.subr.bf16.mxu0 %v470_v20  ;;  %v474_v35 = vpack.c.bf16 %v53_v26, %v52_v25  ;;  %v36_v36 = vld [vmem:[%s807_s1 + $0x70] sm:$0xff]  ;;  %v257_v45 = vld [vmem:[%s809_s3 + $0x8] sm:$0xff]  ;;  %vm267_vm1 = vcmask 261120   ;;  %s349_s8 = sshll.u32 %s550_s7, 4  ;;  %s350_s8 = int_to_ptr.vmem [resolvable:$true] %s349_s8 }
  0x1b   :  { %501 = vmatpush3.bf16.msra.mxu1 %v500_v19  ;;  %v37_v37 = vld [vmem:[%s807_s1 + $0x78] sm:$0xff]  ;;  %v506_v38 = vpack.c.bf16 %v85_v30, %v84_v29  ;;  %v68_v39 = vld [vmem:[%s807_s1 + $0x170] sm:$0xff]  ;;  %v511_v46 = vpack.c.bf16 %v257_v45, %v256_v44  ;;  %v357_v53 = vld [vmem:[%s808_s2] ss:$0 sm:$0xff]  ;;  %s522_s2 = scalar_lea.vmem %s350_s8, 32  ;;  %p527_p1 = scmp.lt.s32.totalorder %s350_s8, %s350_s8 }
  0x1c   :  { %503 = vmatprep.subr.bf16.mxu1 %v502_v23  ;;  %v69_v40 = vld [vmem:[%s807_s1 + $0x178] sm:$0xff]  ;;  %179 = vmatprep.mubr.f32.mxu0 %v109_v32  ;;  %v110_v41 = vcombine.high %v108_v33, %v108_v33  ;;  %v476_v42 = vpack.c.bf16 %v37_v37, %v36_v36  ;;  %v258_v48 = vld [vmem:[%s809_s3 + $0x10] sm:$0xff]  ;;  %v358_v62 = vld [vmem:[%s810_s4] ss:$0 sm:$0xff]  ;;  %p523_p0 = scmp.ne.s32.totalorder %s350_s8, %s522_s2  ;;  %p528_p2 = scmp.lt.s32.totalorder %s522_s2, %s522_s2 }
  0x1d   :  { %473 = vmatpush3.bf16.msra.mxu0 %v472_v31  ;;  %v508_v43 = vpack.c.bf16 %v69_v40, %v68_v39  ;;  %v259_v49 = vld [vmem:[%s809_s3 + $0x18] sm:$0xff] }
  0x1e   :  { %249 = vmatprep.mubr.f32.mxu1 %v110_v41  ;;  %475 = vmatprep.subr.bf16.mxu0 %v474_v35  ;;  %v514_v50 = vpack.c.bf16 %v259_v49, %v258_v48  ;;  %p529_p3 = por %p528_p2, %p527_p1 }
  0x1f   :  { %505 = vmatpush3.bf16.msra.mxu1 %v504_v34 }
  0x20   :  { %507 = vmatprep.subr.bf16.mxu1 %v506_v38  ;;  %p530_p4 = pnand %p529_p3, %p523_p0 }
  0x21   :  { %477 = vmatpush3.bf16.msra.mxu0 %v476_v42 }
  0x22   :  { %510 = vmatprep.subr.bf16.mxu0 %v547_v47 }
  0x23   :  { %509 = vmatpush3.bf16.msra.mxu1 %v508_v43 }
  0x24   :  { %180 = vmatmul.mubr.f32.vlgmr.msra.gmra.mrb[0].mxu0 %v101_v27 }
  0x25   :  { %512 = vmatpush3.bf16.msra.mxu0 %v511_v46  ;;  %443 = vmatprep.mubr.msk.f32.mxu0 %vm548_vm0, %v549_v51 }
  0x26   :  { %250 = vmatmul.mubr.f32.vlgmr.msra.gmra.mrb[0].mxu1 %v108_v33  ;;  %513 = vmatprep.subr.bf16.mxu0 %v547_v47 }
  0x29   :  { %515 = vmatpush3.bf16.msra.mxu0 %v514_v50 }
  0xf7   :  { %v392_v52 = vpop.f32.mrb[0].mxu0 }
  0xf8   :  { %v393_v54 = vpop.f32.mrb[1].mxu0 }
  0xf9   :  { %v427_v55 = vpop.f32.mrb[0].mxu1  ;;  %v394_v56 = vadd.f32 %v393_v54, %v392_v52 }
  0xfa   :  { %v428_v57 = vpop.f32.mrb[1].mxu1 }
  0xfb   :  { %v429_v58 = vadd.f32 %v428_v57, %v427_v55  ;;  %v182_v59 = vadd.f32 %v394_v56, %v357_v53 }
  0xfd   :  { %v252_v60 = vadd.f32 %v429_v58, %v182_v59 }
  0xff   :  { %v255_v61 = vmax.f32 %v252_v60, 0.0 }
 0x101   :  { %444 = vmatmul.mubr.msk.f32.vlgmr.msra.gmra.mrb[2].mxu0 %vm267_vm1, %v255_v61 }
 0x1d4   :  { %v337_v63 = vpop.f32.mrb[2].mxu0 }
 0x1d5   :  { %v338_v0 = vadd.f32 %v358_v62, %v337_v63  ;;  %v445_v1 = vpop.f32.mrb[3].mxu0 }
 0x1d7   :  { %v341_v2 = vmax.f32 %v338_v0, 0.0 }
 0x1d9   :  { %342 = vst [vmem:[#allocation2] sm:$0x3] %v341_v2 }
 0x1da   :  { %533 = shalt.err (!%p530_p4)
}
 0x1db   :  { %s534_s11 = scalar_lea.hbm %s811_s5, 32 }
 0x1dc   :  { %p535_p5 = scmp.ne.s32.totalorder %s811_s5, %s534_s11  ;;  %p538_p6 = scmp.lt.u32.totalorder %s534_s11, %s811_s5 }
 0x1de   :  { %p540_p7 = pnand %p538_p6, %p535_p5 }
 0x1e0   :  { %543 = shalt.err (!%p540_p7)
}
 0x1e1   :  { %352 = dma.vmem_to_hbm [thread:$0]  %s350_s8, 32, %s811_s5, [#allocation3]  }
 0x1e2   :  { %544 = dma.done.wait [#allocation3], 32  }
 0x1e3   :  { %545 = vsyncadd [#allocation3], 4294967264 }
 0x1e4   :  { %356 = vsyncpa [#allocation3], 1 }

</bundles_post_ra>
